<compile_context>
chip_gen: v7x
topology: tpu7x:2x2x1
jax: 0.10.0
libtpu: 0.0.40
codegen_flags: <defaults>
</compile_context>

<pallas_src>
import functools

import jax
import jax.numpy as jnp
from jax import lax
from jax.experimental import pallas as pl
from jax.experimental.pallas import tpu as pltpu


def _focal_loss_kernel(gamma, n_rows, tm,
                       predict_ref, target_ref, fw_ref,
                       out_ref, acc_term_ref, acc_alpha_ref):
    i = pl.program_id(0)

    @pl.when(i == 0)
    def _():
        acc_term_ref[...] = jnp.zeros_like(acc_term_ref)
        acc_alpha_ref[...] = jnp.zeros_like(acc_alpha_ref)

    logits = predict_ref[...]                       # (tm, C) f32
    tgt = target_ref[...]                           # (tm, 1) i32
    c = logits.shape[1]

    # One-hot select built in-register: no one-hot masks streamed from HBM.
    class_ids = lax.broadcasted_iota(jnp.int32, (tm, c), 1)
    sel = class_ids == tgt                          # (tm, C) bool

    # log-sum-exp: log_p = logit_at_target - lse (no full softmax / divide).
    m = jnp.max(logits, axis=1, keepdims=True)                      # (tm, 1)
    lse = m + jnp.log(jnp.sum(jnp.exp(logits - m), axis=1, keepdims=True))
    logit_t = jnp.sum(jnp.where(sel, logits, 0.0), axis=1, keepdims=True)
    log_p = logit_t - lse                                           # (tm, 1)
    probs = jnp.exp(log_p)                                          # (tm, 1)

    one_minus = 1.0 - probs
    if isinstance(gamma, int) and 0 <= gamma <= 8:
        # Integer gamma: unrolled multiplies on the VALU, no EUP pow.
        focal = jnp.ones_like(one_minus)
        for _ in range(gamma):
            focal = focal * one_minus
    else:
        focal = jnp.power(one_minus, float(gamma))
    term = focal * log_p                                            # (tm, 1)

    # alpha[i] = focal_weight[target[i]] via the same mask (VPU select+sum,
    # no degenerate 1-row MXU matmul, no transposed mask operand).
    alpha = jnp.sum(jnp.where(sel, fw_ref[...], 0.0), axis=1, keepdims=True)

    # Mask out rows added by padding N up to a multiple of the tile size.
    row_ids = i * tm + lax.broadcasted_iota(jnp.int32, (tm, 1), 0)
    valid = row_ids < n_rows
    acc_term_ref[...] += jnp.sum(jnp.where(valid, term, 0.0), keepdims=True)
    acc_alpha_ref[...] += jnp.sum(jnp.where(valid, alpha, 0.0), keepdims=True)

    @pl.when(i == pl.num_programs(0) - 1)
    def _():
        inv_nn = 1.0 / float(n_rows * n_rows)
        out_ref[...] = -(acc_term_ref[...] * acc_alpha_ref[...]) * inv_nn


def _round_up(x, m):
    return (x + m - 1) // m * m


def focal_loss(predict, target, focal_weight, class_num, gamma=2,
               reduction="mean", block_rows=512):
    """Pallas-backed FocalLoss.forward (reduction='mean')."""
    # TODO(synk): 'sum' / 'none' reductions are not wired up.
    assert reduction == "mean"
    n, c = predict.shape
    assert c == class_num

    predict = predict.astype(jnp.float32)
    target2d = target.astype(jnp.int32).reshape(n, 1)
    fw = focal_weight.astype(jnp.float32).reshape(1, class_num)

    # Row tile: multiple of 8 (sublane), capped by the (padded) batch size.
    tm = min(block_rows, _round_up(n, 8))
    n_pad = _round_up(n, tm)
    if n_pad != n:
        predict = jnp.pad(predict, ((0, n_pad - n), (0, 0)))
        target2d = jnp.pad(target2d, ((0, n_pad - n), (0, 0)))
    grid = (n_pad // tm,)

    kernel = functools.partial(_focal_loss_kernel, gamma, n, tm)
    out = pl.pallas_call(
        kernel,
        out_shape=jax.ShapeDtypeStruct((1, 1), jnp.float32),
        grid_spec=pltpu.PrefetchScalarGridSpec(
            num_scalar_prefetch=0,
            grid=grid,
            in_specs=[
                pl.BlockSpec((tm, class_num), lambda i: (i, 0)),   # logits tile
                pl.BlockSpec((tm, 1), lambda i: (i, 0)),           # targets tile
                pl.BlockSpec((1, class_num), lambda i: (0, 0)),    # fw (resident)
            ],
            out_specs=pl.BlockSpec((1, 1), lambda i: (0, 0)),      # scalar out
            scratch_shapes=[pltpu.VMEM((1, 1), jnp.float32),       # sum(term)
                            pltpu.VMEM((1, 1), jnp.float32)],      # sum(alpha)
        ),
        compiler_params=pltpu.CompilerParams(
            dimension_semantics=("arbitrary",)),                   # reduction axis
    )(predict, target2d, fw)
    return out[0, 0]


def _reference(predict, target, focal_weight, class_num, gamma=2):
    pt = jax.nn.softmax(predict, axis=1)
    mask = jax.nn.one_hot(target, class_num, dtype=predict.dtype)
    probs = jnp.sum(pt * mask, axis=1, keepdims=True)            # (N, 1)
    alpha = focal_weight[target]                                 # (N,)
    log_p = jnp.log(probs)
    loss = -alpha * (1.0 - probs) ** gamma * log_p               # (N, N) broadcast
    return loss.mean()


if __name__ == "__main__":
    key = jax.random.PRNGKey(0)

    # Small case: single tile.
    N, C = 8, 16
    k1, k2 = jax.random.split(key)
    predict = jax.random.normal(k1, (N, C), dtype=jnp.float32)
    target = jax.random.randint(k2, (N,), 0, C, dtype=jnp.int32)
    focal_weight = jnp.linspace(0.5, 1.5, C, dtype=jnp.float32)

    out = focal_loss(predict, target, focal_weight, class_num=C, gamma=2)
    out = jax.block_until_ready(out)
    ref = _reference(predict, target, focal_weight, class_num=C, gamma=2)
    assert jnp.allclose(out, ref, rtol=1e-5, atol=1e-6), (out, ref)

    # Slightly larger case: exercises grid > 1 and row-padding mask.
    N2, C2 = 300, 16
    k3, k4 = jax.random.split(k1)
    predict2 = jax.random.normal(k3, (N2, C2), dtype=jnp.float32)
    target2 = jax.random.randint(k4, (N2,), 0, C2, dtype=jnp.int32)
    focal_weight2 = jnp.linspace(0.25, 2.0, C2, dtype=jnp.float32)

    out2 = focal_loss(predict2, target2, focal_weight2, class_num=C2,
                      gamma=2, block_rows=128)
    out2 = jax.block_until_ready(out2)
    ref2 = _reference(predict2, target2, focal_weight2, class_num=C2, gamma=2)
    assert jnp.allclose(out2, ref2, rtol=1e-5, atol=1e-6), (out2, ref2)

    print("KERNEL_OK")
</pallas_src>

<mosaic_0001>
module attributes {stable_mosaic.version = 11 : i64} {
  func.func @_focal_loss_kernel(%arg0: i32, %arg1: memref<8x16xf32, #tpu.memory_space<vmem>>, %arg2: memref<8x1xi32, #tpu.memory_space<vmem>>, %arg3: memref<1x16xf32, #tpu.memory_space<vmem>>, %arg4: memref<1x1xf32, #tpu.memory_space<vmem>>, %arg5: memref<1x1xf32, #tpu.memory_space<vmem>>, %arg6: memref<1x1xf32, #tpu.memory_space<vmem>>) attributes {dimension_semantics = [#tpu.dimension_semantics<arbitrary>], iteration_bounds = array<i64: 1>, scalar_prefetch = 0 : i64, scratch_operands = 2 : i64, tpu.core_type = #tpu.core_type<tc>, window_params = [{transform_indices = @transform_0, window_bounds = array<i64: 8, 16>}, {transform_indices = @transform_1, window_bounds = array<i64: 8, 1>}, {pipeline_mode = #tpu.pipeline_mode<synchronous>, transform_indices = @transform_2, window_bounds = array<i64: 1, 16>}, {pipeline_mode = #tpu.pipeline_mode<synchronous>, transform_indices = @transform_3, window_bounds = array<i64: 1, 1>}]} {
    %c0_i32 = arith.constant 0 : i32
    %0 = arith.cmpi eq, %arg0, %c0_i32 : i32
    %1 = arith.extui %0 : i1 to i32
    %c0_i32_0 = arith.constant 0 : i32
    %2 = arith.cmpi ne, %1, %c0_i32_0 : i32
    scf.if %2 {
      %cst_28 = arith.constant 0.000000e+00 : f32
      %65 = vector.broadcast %cst_28 : f32 to vector<1x1xf32>
      %c0_29 = arith.constant 0 : index
      %c0_30 = arith.constant 0 : index
      %66 = vector.load %arg5[%c0_29, %c0_30] : memref<1x1xf32, #tpu.memory_space<vmem>>, vector<1x1xf32>
      tpu.vector_store %arg5[%c0_29, %c0_30], %65 {strides = array<i32>} : memref<1x1xf32, #tpu.memory_space<vmem>>, vector<1x1xf32>,
      %cst_31 = arith.constant 0.000000e+00 : f32
      %67 = vector.broadcast %cst_31 : f32 to vector<1x1xf32>
      %c0_32 = arith.constant 0 : index
      %c0_33 = arith.constant 0 : index
      %68 = vector.load %arg6[%c0_32, %c0_33] : memref<1x1xf32, #tpu.memory_space<vmem>>, vector<1x1xf32>
      tpu.vector_store %arg6[%c0_32, %c0_33], %67 {strides = array<i32>} : memref<1x1xf32, #tpu.memory_space<vmem>>, vector<1x1xf32>,
    } else {
    }
    %c0 = arith.constant 0 : index
    %c0_1 = arith.constant 0 : index
    %3 = vector.load %arg1[%c0, %c0_1] : memref<8x16xf32, #tpu.memory_space<vmem>>, vector<8x16xf32>
    %c0_2 = arith.constant 0 : index
    %c0_3 = arith.constant 0 : index
    %4 = vector.load %arg2[%c0_2, %c0_3] : memref<8x1xi32, #tpu.memory_space<vmem>>, vector<8x1xi32>
    %5 = tpu.iota {dimensions = array<i32: 1>} : vector<8x16xi32>
    %6 = vector.broadcast %4 : vector<8x1xi32> to vector<8x16xi32>
    %7 = arith.cmpi eq, %5, %6 : vector<8x16xi32>
    %cst = arith.constant dense<0xFF800000> : vector<8xf32>
    %8 = vector.multi_reduction <maximumf>, %3, %cst [1] : vector<8x16xf32> to vector<8xf32>
    %9 = vector.shape_cast %8 : vector<8xf32> to vector<8x1xf32>
    %10 = vector.broadcast %9 : vector<8x1xf32> to vector<8x16xf32>
    %11 = arith.subf %3, %10 : vector<8x16xf32>
    %12 = math.exp %11 : vector<8x16xf32>
    %cst_4 = arith.constant dense<0.000000e+00> : vector<8xf32>
    %13 = vector.multi_reduction <add>, %12, %cst_4 [1] : vector<8x16xf32> to vector<8xf32>
    %14 = vector.shape_cast %13 : vector<8xf32> to vector<8x1xf32>
    %15 = math.log %14 : vector<8x1xf32>
    %16 = arith.addf %9, %15 : vector<8x1xf32>
    %cst_5 = arith.constant 0.000000e+00 : f32
    %17 = vector.broadcast %cst_5 : f32 to vector<8x16xf32>
    %18 = arith.select %7, %3, %17 : vector<8x16xi1>, vector<8x16xf32>
    %cst_6 = arith.constant dense<0.000000e+00> : vector<8xf32>
    %19 = vector.multi_reduction <add>, %18, %cst_6 [1] : vector<8x16xf32> to vector<8xf32>
    %20 = vector.shape_cast %19 : vector<8xf32> to vector<8x1xf32>
    %21 = arith.subf %20, %16 : vector<8x1xf32>
    %22 = math.exp %21 : vector<8x1xf32>
    %cst_7 = arith.constant 1.000000e+00 : f32
    %23 = vector.broadcast %cst_7 : f32 to vector<8x1xf32>
    %24 = arith.subf %23, %22 : vector<8x1xf32>
    %cst_8 = arith.constant 1.000000e+00 : f32
    %25 = vector.broadcast %cst_8 : f32 to vector<8x1xf32>
    %26 = arith.mulf %25, %24 : vector<8x1xf32>
    %27 = arith.mulf %26, %24 : vector<8x1xf32>
    %28 = arith.mulf %27, %21 : vector<8x1xf32>
    %c0_9 = arith.constant 0 : index
    %c0_10 = arith.constant 0 : index
    %29 = vector.load %arg3[%c0_9, %c0_10] : memref<1x16xf32, #tpu.memory_space<vmem>>, vector<1x16xf32>
    %cst_11 = arith.constant 0.000000e+00 : f32
    %30 = vector.shape_cast %29 : vector<1x16xf32> to vector<1x16xf32>
    %31 = vector.broadcast %30 : vector<1x16xf32> to vector<8x16xf32>
    %32 = vector.broadcast %cst_11 : f32 to vector<8x16xf32>
    %33 = arith.select %7, %31, %32 : vector<8x16xi1>, vector<8x16xf32>
    %cst_12 = arith.constant dense<0.000000e+00> : vector<8xf32>
    %34 = vector.multi_reduction <add>, %33, %cst_12 [1] : vector<8x16xf32> to vector<8xf32>
    %35 = vector.shape_cast %34 : vector<8xf32> to vector<8x1xf32>
    %c8_i32 = arith.constant 8 : i32
    %36 = arith.muli %arg0, %c8_i32 : i32
    %37 = tpu.iota {dimensions = array<i32: 0>} : vector<8x1xi32>
    %38 = vector.broadcast %36 : i32 to vector<8x1xi32>
    %39 = arith.addi %38, %37 : vector<8x1xi32>
    %c8_i32_13 = arith.constant 8 : i32
    %40 = vector.broadcast %c8_i32_13 : i32 to vector<8x1xi32>
    %41 = arith.cmpi slt, %39, %40 : vector<8x1xi32>
    %c0_14 = arith.constant 0 : index
    %c0_15 = arith.constant 0 : index
    %42 = vector.load %arg5[%c0_14, %c0_15] : memref<1x1xf32, #tpu.memory_space<vmem>>, vector<1x1xf32>
    %cst_16 = arith.constant 0.000000e+00 : f32
    %43 = vector.broadcast %cst_16 : f32 to vector<8x1xf32>
    %44 = arith.select %41, %28, %43 : vector<8x1xi1>, vector<8x1xf32>
    %45 = vector.shape_cast %44 : vector<8x1xf32> to vector<1x8x1xf32>
    %cst_17 = arith.constant dense<0.000000e+00> : vector<1xf32>
    %46 = vector.multi_reduction <add>, %45, %cst_17 [1, 2] : vector<1x8x1xf32> to vector<1xf32>
    %47 = vector.shape_cast %46 : vector<1xf32> to vector<1x1x1xf32>
    %48 = vector.extract %47[0, 0, 0] : f32 from vector<1x1x1xf32>
    %49 = vector.broadcast %48 : f32 to vector<1x1xf32>
    %50 = arith.addf %42, %49 : vector<1x1xf32>
    %c0_18 = arith.constant 0 : index
    %c0_19 = arith.constant 0 : index
    %51 = vector.load %arg5[%c0_18, %c0_19] : memref<1x1xf32, #tpu.memory_space<vmem>>, vector<1x1xf32>
    tpu.vector_store %arg5[%c0_18, %c0_19], %50 {strides = array<i32>} : memref<1x1xf32, #tpu.memory_space<vmem>>, vector<1x1xf32>,
    %c0_20 = arith.constant 0 : index
    %c0_21 = arith.constant 0 : index
    %52 = vector.load %arg6[%c0_20, %c0_21] : memref<1x1xf32, #tpu.memory_space<vmem>>, vector<1x1xf32>
    %cst_22 = arith.constant 0.000000e+00 : f32
    %53 = vector.broadcast %cst_22 : f32 to vector<8x1xf32>
    %54 = arith.select %41, %35, %53 : vector<8x1xi1>, vector<8x1xf32>
    %55 = vector.shape_cast %54 : vector<8x1xf32> to vector<1x8x1xf32>
    %cst_23 = arith.constant dense<0.000000e+00> : vector<1xf32>
    %56 = vector.multi_reduction <add>, %55, %cst_23 [1, 2] : vector<1x8x1xf32> to vector<1xf32>
    %57 = vector.shape_cast %56 : vector<1xf32> to vector<1x1x1xf32>
    %58 = vector.extract %57[0, 0, 0] : f32 from vector<1x1x1xf32>
    %59 = vector.broadcast %58 : f32 to vector<1x1xf32>
    %60 = arith.addf %52, %59 : vector<1x1xf32>
    %c0_24 = arith.constant 0 : index
    %c0_25 = arith.constant 0 : index
    %61 = vector.load %arg6[%c0_24, %c0_25] : memref<1x1xf32, #tpu.memory_space<vmem>>, vector<1x1xf32>
    tpu.vector_store %arg6[%c0_24, %c0_25], %60 {strides = array<i32>} : memref<1x1xf32, #tpu.memory_space<vmem>>, vector<1x1xf32>,
    %c0_i32_26 = arith.constant 0 : i32
    %62 = arith.cmpi eq, %arg0, %c0_i32_26 : i32
    %63 = arith.extui %62 : i1 to i32
    %c0_i32_27 = arith.constant 0 : i32
    %64 = arith.cmpi ne, %63, %c0_i32_27 : i32
    scf.if %64 {
      %c0_28 = arith.constant 0 : index
      %c0_29 = arith.constant 0 : index
      %65 = vector.load %arg5[%c0_28, %c0_29] : memref<1x1xf32, #tpu.memory_space<vmem>>, vector<1x1xf32>
      %c0_30 = arith.constant 0 : index
      %c0_31 = arith.constant 0 : index
      %66 = vector.load %arg6[%c0_30, %c0_31] : memref<1x1xf32, #tpu.memory_space<vmem>>, vector<1x1xf32>
      %67 = arith.mulf %65, %66 : vector<1x1xf32>
      %cst_32 = arith.constant 0.000000e+00 : f32
      %68 = vector.broadcast %cst_32 : f32 to vector<1x1xf32>
      %69 = arith.subf %68, %67 : vector<1x1xf32>
      %cst_33 = arith.constant 1.562500e-02 : f32
      %70 = vector.broadcast %cst_33 : f32 to vector<1x1xf32>
      %71 = arith.mulf %69, %70 : vector<1x1xf32>
      %c0_34 = arith.constant 0 : index
      %c0_35 = arith.constant 0 : index
      %72 = vector.load %arg4[%c0_34, %c0_35] : memref<1x1xf32, #tpu.memory_space<vmem>>, vector<1x1xf32>
      tpu.vector_store %arg4[%c0_34, %c0_35], %71 {strides = array<i32>} : memref<1x1xf32, #tpu.memory_space<vmem>>, vector<1x1xf32>,
    } else {
    }
    return
  }
  func.func @transform_0(%arg0: i32) -> (i32, i32) {
    %c0_i32 = arith.constant 0 : i32
    %c0_i32_0 = arith.constant 0 : i32
    return %arg0, %c0_i32 : i32, i32
  }
  func.func @transform_1(%arg0: i32) -> (i32, i32) {
    %c0_i32 = arith.constant 0 : i32
    %c0_i32_0 = arith.constant 0 : i32
    return %arg0, %c0_i32 : i32, i32
  }
  func.func @transform_2(%arg0: i32) -> (i32, i32) {
    %c0_i32 = arith.constant 0 : i32
    %c0_i32_0 = arith.constant 0 : i32
    %c0_i32_1 = arith.constant 0 : i32
    return %c0_i32, %c0_i32_0 : i32, i32
  }
  func.func @transform_3(%arg0: i32) -> (i32, i32) {
    %c0_i32 = arith.constant 0 : i32
    %c0_i32_0 = arith.constant 0 : i32
    %c0_i32_1 = arith.constant 0 : i32
    return %c0_i32, %c0_i32_0 : i32, i32
  }
}

</mosaic_0001>

<bundles_post_ra>
// kernel: tpu_custom_call.1
= control target key start
LH: loop header
LB: loop body
LE: loop exit
PB: predicated region body
PF: predicated region fallthrough
CT: control target
= control target key end

     0   :  { %vm30_vm0 = vcmask 130048   ;;  %s217_s0 = inlined_call_operand.vmem [shape: f32[8,16], index: 0, kind: input, shape index: {}]   ;;  %s218_s1 = inlined_call_operand.vmem [shape: s32[8,1], index: 1, kind: input, shape index: {}]   ;;  %s219_s2 = inlined_call_operand.vmem [shape: f32[1,16], index: 2, kind: input, shape index: {}]   ;;  %s220_s3 = inlined_call_operand.hbm [shape: f32[1,1], index: 3, kind: output, shape index: {}]  }
   0x1   :  { %v22_v0 = vld [vmem:[%s217_s0] sm:$0xff] }
   0x2   :  { %8 = vsyncpa [#allocation5], 0  ;;  %v31_v1 = vsel %vm30_vm0, %v22_v0, -inf  ;;  %v164_v2 = vmov 0   ;;  %v23_v3 = vld [vmem:[%s218_s1] sm:$0xff]  ;;  %v24_v7 = vlaneseq  ;;  %vm72_vm2 = vcmask 7168  }
   0x3   :  { %133 = vset.pattern.permute.xlu0 %v164_v2  ;;  %v125_v13 = vld [vmem:[%s219_s2] ss:$0 sm:$0xff]  ;;  %vm19_vm3 = vcmask 0   ;;  %v165_v31 = vmov 0.0   ;;  %s166_s17 = smov [#allocation4]  }
   0x4   :  { %32 = vmax.xlane.f32.xlu0 %v31_v1  ;;  %v25_v8 = vand.u32 127, %v24_v7  ;;  %20 = vst.msk [vmem:[#allocation2] sm:$0x1] %vm19_vm3, %v165_v31  ;;  %21 = vst.msk [vmem:[#allocation3] sm:$0x1] %vm19_vm3, %v165_v31  ;;  %s117_s18 = sshll.u32 %s166_s17, 4  ;;  %s118_s18 = int_to_ptr.vmem [resolvable:$true] %s117_s18 }
   0x5   :  { %s140_s19 = scalar_lea.vmem %s118_s18, 16  ;;  %s144_s20 = scalar_lea.vmem %s118_s18, 32 }
   0x6   :  { %p141_p0 = scmp.ne.s32.totalorder %s118_s18, %s140_s19  ;;  %p145_p1 = scmp.lt.s32.totalorder %s118_s18, %s118_s18 }
   0x7   :  { %p146_p2 = scmp.lt.s32.totalorder %s144_s20, %s140_s19 }
   0x9   :  { %p147_p3 = por %p146_p2, %p145_p1 }
   0xb   :  { %v70_v46 = vld [vmem:[#allocation2] sm:$0x1]  ;;  %v87_v49 = vld [vmem:[#allocation3] sm:$0x1]  ;;  %p148_p4 = pnand %p147_p3, %p141_p0 }
  0x1a   :  { %27 = vperm.xlu0 %133, %v23_v3  }
  0x91   :  { %v33_v4 = vpop.xlane.xlu0 %32 }
  0x92   :  { %v34_v5 = vsub.f32 %v22_v0, %v33_v4 }
  0x94   :  { %v35_v6 = vmul.f32 1.442695, %v34_v5 }
  0x96   :  { %134 = vpow2.f32 %v35_v6 }
  0x99   :  { %v28_v9 = vpop.permute.xlu0 %27 }
  0x9a   :  { %vm29_vm1 = vcmp.eq.s32.totalorder %v25_v8, %v28_v9 }
  0x9b   :  { %v43_v11 = vsel %vm29_vm1, %v22_v0, 0.0  ;;  %v60_v15 = vsel %vm29_vm1, %v125_v13, 0.0 }
  0x9c   :  { %v44_v14 = vsel %vm30_vm0, %v43_v11, 0.0  ;;  %v61_v16 = vsel %vm30_vm0, %v60_v15, 0.0 }
  0xa0   :  { %v135_v10 = vpop.eup %134 }
  0xa1   :  { %v37_v12 = vsel %vm30_vm0, %v135_v10, 0.0 }
  0xa2   :  { %38 = vadd.xlane.f32.xlu1 %v37_v12 }
  0xa6   :  { %45 = vadd.xlane.f32.xlu1 %v44_v14 }
  0xaa   :  { %62 = vadd.xlane.f32.xlu1 %v61_v16 }
 0x12f   :  { %v39_v17 = vpop.xlane.xlu1 %38 }
 0x130   :  { %136 = vlog2.f32 %v39_v17 }
 0x133   :  { %v46_v21 = vpop.xlane.xlu1 %45 }
 0x137   :  { %v63_v29 = vpop.xlane.xlu1 %62 }
 0x138   :  { %v89_v30 = vsel %vm72_vm2, %v63_v29, 0.0 }
 0x13a   :  { %v137_v18 = vpop.eup %136 }
 0x13b   :  { %v41_v19 = vmul.f32 0.6931472, %v137_v18 }
 0x13d   :  { %v42_v20 = vadd.f32 %v41_v19, %v33_v4 }
 0x13f   :  { %v47_v22 = vsub.f32 %v46_v21, %v42_v20 }
 0x141   :  { %v48_v23 = vmul.f32 1.442695, %v47_v22 }
 0x143   :  { %138 = vpow2.f32 %v48_v23 }
 0x14d   :  { %v139_v24 = vpop.eup %138 }
 0x14e   :  { %v50_v25 = vsub.f32 1.0, %v139_v24 }
 0x150   :  { %v51_v26 = vmul.f32 %v50_v25, %v50_v25 }
 0x152   :  { %v52_v27 = vmul.f32 %v51_v26, %v47_v22 }
 0x154   :  { %v73_v28 = vsel %vm72_vm2, %v52_v27, 0.0 }
 0x155   :  { %74 = vadd.xlane.f32.xlu1 %v73_v28 }
 0x159   :  { %90 = vadd.xlane.f32.xlu1 %v89_v30 }
 0x1e2   :  { %v75_v32 = vpop.xlane.xlu1 %74 }
 0x1e3   :  { %v76_v33 = vrot.slane %v75_v32, 4 }
 0x1e5   :  { %v77_v34 = vadd.f32 %v76_v33, %v75_v32 }
 0x1e6   :  { %v91_v35 = vpop.xlane.xlu1 %90 }
 0x1e7   :  { %v78_v36 = vrot.slane %v77_v34, 2  ;;  %v92_v37 = vrot.slane %v91_v35, 4 }
 0x1e9   :  { %v93_v38 = vadd.f32 %v92_v37, %v91_v35  ;;  %v79_v39 = vadd.f32 %v78_v36, %v77_v34 }
 0x1eb   :  { %v94_v40 = vrot.slane %v93_v38, 2  ;;  %v80_v41 = vrot.slane %v79_v39, 1 }
 0x1ed   :  { %v95_v42 = vadd.f32 %v94_v40, %v93_v38  ;;  %v81_v43 = vadd.f32 %v80_v41, %v79_v39 }
 0x1ef   :  { %126 = vpush %v81_v43  ;;  %v96_v44 = vrot.slane %v95_v42, 1 }
 0x1f1   :  { %v97_v45 = vadd.f32 %v96_v44, %v95_v42 }
 0x1f3   :  { %128 = vpush %v97_v45 }
 0x220   :  { %s127_s1 = spop %126 }
 0x221   :  { %v83_v47 = vstv %s127_s1 }
 0x222   :  { %v84_v48 = vadd.f32 %v83_v47, %v70_v46 }
 0x224   :  { %86 = vst.msk [vmem:[#allocation2] sm:$0x1] %vm19_vm3, %v84_v48  ;;  %s129_s2 = spop %128 }
 0x225   :  { %v99_v50 = vstv %s129_s2 }
 0x226   :  { %v100_v51 = vadd.f32 %v99_v50, %v87_v49 }
 0x228   :  { %101 = vst.msk [vmem:[#allocation3] sm:$0x1] %vm19_vm3, %v100_v51 }
 0x22b   :  { %v105_v52 = vld [vmem:[#allocation2] sm:$0x1] }
 0x22f   :  { %v106_v53 = vld [vmem:[#allocation3] sm:$0x1] }
 0x230   :  { %v107_v54 = vmul.f32 %v106_v53, %v105_v52 }
 0x232   :  { %v108_v55 = vsub.f32 0.0, %v107_v54 }
 0x234   :  { %v109_v56 = vmul.f32 0.015625, %v108_v55 }
 0x236   :  { %110 = vst.msk [vmem:[#allocation4] sm:$0x1] %vm19_vm3, %v109_v56 }
 0x237   :  { %151 = shalt.err (!%p148_p4)
}
 0x238   :  { %s152_s23 = scalar_lea.hbm %s220_s3, 16 }
 0x239   :  { %p153_p5 = scmp.ne.s32.totalorder %s220_s3, %s152_s23  ;;  %p156_p6 = scmp.lt.u32.totalorder %s152_s23, %s220_s3 }
 0x23b   :  { %p158_p7 = pnand %p156_p6, %p153_p5 }
 0x23d   :  { %161 = shalt.err (!%p158_p7)
}
 0x23e   :  { %120 = dma.vmem_to_hbm [thread:$0]  %s118_s18, 16, %s220_s3, [#allocation5]  }
 0x23f   :  { %162 = dma.done.wait [#allocation5], 16  }
 0x240   :  { %163 = vsyncadd [#allocation5], 4294967280 }
 0x241   :  { %124 = vsyncpa [#allocation5], 1 }

</bundles_post_ra>
